<compile_context>
chip_gen: v7x
topology: tpu7x:2x2x1
jax: 0.10.0
libtpu: 0.0.40
codegen_flags: <defaults>
</compile_context>

<pallas_src>
import functools

import jax
import jax.numpy as jnp
from jax.experimental import pallas as pl
from jax.experimental.pallas import tpu as pltpu

_NEG = -1e9        # logit bias for padded classes (exp() underflows to 0)
_MID = 300         # hidden width of linear_layer (from the PyTorch spec)
_MID_P = 384       # lane-padded hidden width (zero-padded)
_LANES = 128


def _round_up(x, m):
    return (x + m - 1) // m * m


def _weighted_ce_partial(logits, targets_2d, cw_2d):
    """Per-tile partial sums for weighted CE (PyTorch semantics)."""
    m = jnp.max(logits, axis=-1, keepdims=True)
    shifted = logits - m
    lse = jnp.log(jnp.sum(jnp.exp(shifted), axis=-1, keepdims=True))
    logp = shifted - lse                                        # [TB, CP]
    col = jax.lax.broadcasted_iota(jnp.int32, logp.shape, 1)    # [TB, CP]
    onehot = (col == targets_2d).astype(jnp.float32)            # [TB, CP]
    nll = -jnp.sum(logp * onehot, axis=-1, keepdims=True)       # [TB, 1]
    w_per = jnp.sum(cw_2d * onehot, axis=-1, keepdims=True)     # [TB, 1]
    num = jnp.sum(w_per * nll, axis=(0, 1), keepdims=True)      # [1, 1]
    den = jnp.sum(w_per, axis=(0, 1), keepdims=True)            # [1, 1]
    return num, den


def _features_f32(rep_a_ref, rep_b_ref):
    a = rep_a_ref[...].astype(jnp.float32)
    b = rep_b_ref[...].astype(jnp.float32)
    return a, b, jnp.abs(a - b), a * b


def _feature_matmul(parts_f32, w_ref, hidden_size, split_k):
    """concat(parts, 1) @ W.  split_k: ref-sliced K panels (no whole-W load,
    no concat) when H is a multiple of 128; otherwise a single K=4H dot."""
    H = hidden_size
    if split_k:
        acc = None
        for k, p in enumerate(parts_f32):
            panel = w_ref[k * H:(k + 1) * H, :]        # static ref slice
            d = jnp.dot(p.astype(jnp.bfloat16), panel,
                        preferred_element_type=jnp.float32)
            acc = d if acc is None else acc + d
        return acc
    feats = jnp.concatenate(parts_f32, axis=1).astype(jnp.bfloat16)
    return jnp.dot(feats, w_ref[...], preferred_element_type=jnp.float32)


def _finalize(out_ref, num_ref, den_ref):
    lane = jax.lax.broadcasted_iota(jnp.int32, out_ref.shape, 2)
    out_ref[...] = jnp.where(lane == 0, num_ref[...],
                             jnp.where(lane == 1, den_ref[...], 0.0))


def _hidden_kernel(rep_a_ref, rep_b_ref, targets_ref, cw_ref,
                   w1_ref, b1_ref, w2_ref, b2_ref,
                   out_ref, num_ref, den_ref, *, hidden_size, split_k):
    """use_hidden_layer=True: linear(4H->300) -> dropout -> ReLU -> linear(300->C)."""
    t = pl.program_id(1)

    @pl.when(t == 0)
    def _():
        num_ref[...] = jnp.zeros_like(num_ref)
        den_ref[...] = jnp.zeros_like(den_ref)

    parts = _features_f32(rep_a_ref, rep_b_ref)
    h = _feature_matmul(parts, w1_ref, hidden_size, split_k) + b1_ref[...]
    # TODO(synk): nn.Dropout is identity at inference; training-mode stochastic
    # dropout (pltpu.prng_seed + prng_random_bits mask) is not implemented.
    h = jnp.maximum(h, 0.0)
    logits = jnp.dot(h.astype(jnp.bfloat16), w2_ref[...],
                     preferred_element_type=jnp.float32) + b2_ref[...]
    num, den = _weighted_ce_partial(logits, targets_ref[...], cw_ref[...])
    num_ref[...] += num
    den_ref[...] += den

    @pl.when(t == pl.num_programs(1) - 1)
    def _():
        _finalize(out_ref, num_ref, den_ref)


def _simple_kernel(rep_a_ref, rep_b_ref, targets_ref, cw_ref,
                   w3_ref, b3_ref,
                   out_ref, num_ref, den_ref, *, hidden_size, split_k):
    """use_hidden_layer=False: single linear(4H->C)."""
    t = pl.program_id(1)

    @pl.when(t == 0)
    def _():
        num_ref[...] = jnp.zeros_like(num_ref)
        den_ref[...] = jnp.zeros_like(den_ref)

    parts = _features_f32(rep_a_ref, rep_b_ref)
    logits = _feature_matmul(parts, w3_ref, hidden_size, split_k) + b3_ref[...]
    num, den = _weighted_ce_partial(logits, targets_ref[...], cw_ref[...])
    num_ref[...] += num
    den_ref[...] += den

    @pl.when(t == pl.num_programs(1) - 1)
    def _():
        _finalize(out_ref, num_ref, den_ref)


def softmax_loss(rep_a, rep_b, targets, classes_weight, params,
                 use_hidden_layer=True):
    B, H = rep_a.shape
    C = int(classes_weight.shape[0])
    CP = _round_up(max(C, 1), _LANES)          # lane-padded class dim (>=128)

    # ---- batch tiling: TB rows per grid step; 2 "parallel" chunks when possible.
    TB = 256 if B >= 256 else _round_up(max(B, 16), 16)
    n_tiles = -(-B // TB)
    NC = 2 if n_tiles >= 2 else 1              # outer chunks -> megacore parallel
    NT = -(-n_tiles // NC)                     # inner reduction steps per chunk
    B_pad = NC * NT * TB

    # ---- pad / cast operands.  Padded rows get the zero-weight padded class
    #      so they contribute exactly 0 to both num and den.
    a_p = jnp.zeros((B_pad, H), jnp.bfloat16).at[:B].set(rep_a.astype(jnp.bfloat16))
    b_p = jnp.zeros((B_pad, H), jnp.bfloat16).at[:B].set(rep_b.astype(jnp.bfloat16))
    t_p = jnp.full((B_pad, 1), C, jnp.int32).at[:B, 0].set(targets.astype(jnp.int32))
    cw_p = jnp.zeros((1, CP), jnp.float32).at[0, :C].set(
        classes_weight.astype(jnp.float32))

    split_k = (H % 128 == 0)

    row_spec = pl.BlockSpec((TB, H), lambda c, t: (c * NT + t, 0))
    tgt_spec = pl.BlockSpec((TB, 1), lambda c, t: (c * NT + t, 0))

    def const2(shape):
        return pl.BlockSpec(shape, lambda c, t: (0, 0))   # resident across grid

    if use_hidden_layer:
        w1 = jnp.zeros((4 * H, _MID_P), jnp.float32).at[:, :_MID].set(
            params["w1"]).astype(jnp.bfloat16)
        b1 = jnp.zeros((1, _MID_P), jnp.float32).at[0, :_MID].set(params["b1"])
        w2 = jnp.zeros((_MID_P, CP), jnp.float32).at[:_MID, :C].set(
            params["w2"]).astype(jnp.bfloat16)
        b2 = jnp.full((1, CP), _NEG, jnp.float32).at[0, :C].set(params["b2"])
        kernel = functools.partial(_hidden_kernel, hidden_size=H, split_k=split_k)
        args = (a_p, b_p, t_p, cw_p, w1, b1, w2, b2)
        in_specs = [row_spec, row_spec, tgt_spec, const2((1, CP)),
                    const2((4 * H, _MID_P)), const2((1, _MID_P)),
                    const2((_MID_P, CP)), const2((1, CP))]
        flops = 2 * B_pad * (4 * H * _MID_P + _MID_P * CP)
    else:
        w3 = jnp.zeros((4 * H, CP), jnp.float32).at[:, :C].set(
            params["w3"]).astype(jnp.bfloat16)
        b3 = jnp.full((1, CP), _NEG, jnp.float32).at[0, :C].set(params["b3"])
        kernel = functools.partial(_simple_kernel, hidden_size=H, split_k=split_k)
        args = (a_p, b_p, t_p, cw_p, w3, b3)
        in_specs = [row_spec, row_spec, tgt_spec, const2((1, CP)),
                    const2((4 * H, CP)), const2((1, CP))]
        flops = 2 * B_pad * (4 * H * CP)

    bytes_accessed = int(sum(x.size * x.dtype.itemsize for x in args)
                         + NC * _LANES * 4)

    partials = pl.pallas_call(
        kernel,
        out_shape=jax.ShapeDtypeStruct((NC, 1, _LANES), jnp.float32),
        grid_spec=pltpu.PrefetchScalarGridSpec(
            num_scalar_prefetch=0,
            grid=(NC, NT),
            in_specs=in_specs,
            out_specs=pl.BlockSpec((1, 1, _LANES), lambda c, t: (c, 0, 0)),
            scratch_shapes=[pltpu.VMEM((1, 1), jnp.float32),   # num accumulator
                            pltpu.VMEM((1, 1), jnp.float32)],  # den accumulator
        ),
        compiler_params=pltpu.CompilerParams(
            dimension_semantics=("parallel", "arbitrary"),
            vmem_limit_bytes=48 * 1024 * 1024),
        cost_estimate=pl.CostEstimate(flops=flops,
                                      transcendentals=B_pad * CP,
                                      bytes_accessed=bytes_accessed),
    )(*args)

    num = jnp.sum(partials[:, 0, 0])
    den = jnp.sum(partials[:, 0, 1])
    return num / den


def _init_params(key, hidden_size, num_labels, mid=_MID):
    """Deterministic init mimicking nn.Linear default uniform(-1/sqrt(in), 1/sqrt(in))."""
    in1 = 4 * hidden_size
    k = jax.random.split(key, 6)

    def u(kk, shape, fan_in):
        b = 1.0 / jnp.sqrt(fan_in)
        return jax.random.uniform(kk, shape, jnp.float32, -b, b)

    return {
        "w1": u(k[0], (in1, mid), in1),
        "b1": u(k[1], (mid,), in1),
        "w2": u(k[2], (mid, num_labels), mid),
        "b2": u(k[3], (num_labels,), mid),
        "w3": u(k[4], (in1, num_labels), in1),
        "b3": u(k[5], (num_labels,), in1),
    }


def _reference(rep_a, rep_b, targets, classes_weight, params, use_hidden_layer=True):
    """Pure-JAX f32 reference (PyTorch semantics) for sanity checking."""
    feats = jnp.concatenate(
        [rep_a, rep_b, jnp.abs(rep_a - rep_b), rep_a * rep_b], axis=1)
    if use_hidden_layer:
        h = feats @ params["w1"] + params["b1"]
        h = jnp.maximum(h, 0.0)
        logits = h @ params["w2"] + params["b2"]
    else:
        logits = feats @ params["w3"] + params["b3"]
    logp = jax.nn.log_softmax(logits, axis=-1)
    nll = -jnp.take_along_axis(logp, targets[:, None], axis=1)[:, 0]
    w = classes_weight[targets]
    return jnp.sum(w * nll) / jnp.sum(w)


if __name__ == "__main__":
    B, H, C = 8, 32, 4  # batch, bert_hidden_size, class_num

    key = jax.random.PRNGKey(0)
    k_a, k_b, k_t, k_p = jax.random.split(key, 4)
    rep_a = jax.random.normal(k_a, (B, H), jnp.float32)
    rep_b = jax.random.normal(k_b, (B, H), jnp.float32)
    targets = jax.random.randint(k_t, (B,), 0, C, jnp.int32)
    classes_weight = jnp.array([1.0, 2.0, 0.5, 1.5], jnp.float32)
    params = _init_params(k_p, H, C)

    # use_hidden_layer=True path (linear_layer -> ReLU -> linear_layer2)
    loss = jax.block_until_ready(
        softmax_loss(rep_a, rep_b, targets, classes_weight, params,
                     use_hidden_layer=True))
    ref = _reference(rep_a, rep_b, targets, classes_weight, params,
                     use_hidden_layer=True)
    assert jnp.allclose(loss, ref, rtol=5e-2, atol=5e-2), (loss, ref)

    # use_hidden_layer=False path (linear_layer3)
    loss2 = jax.block_until_ready(
        softmax_loss(rep_a, rep_b, targets, classes_weight, params,
                     use_hidden_layer=False))
    ref2 = _reference(rep_a, rep_b, targets, classes_weight, params,
                      use_hidden_layer=False)
    assert jnp.allclose(loss2, ref2, rtol=5e-2, atol=5e-2), (loss2, ref2)

    print("KERNEL_OK")
</pallas_src>

<mosaic_0001>
module attributes {stable_mosaic.version = 11 : i64} {
  func.func @_hidden_kernel(%arg0: i32, %arg1: i32, %arg2: memref<16x32xbf16, #tpu.memory_space<vmem>>, %arg3: memref<16x32xbf16, #tpu.memory_space<vmem>>, %arg4: memref<16x1xi32, #tpu.memory_space<vmem>>, %arg5: memref<1x128xf32, #tpu.memory_space<vmem>>, %arg6: memref<128x384xbf16, #tpu.memory_space<vmem>>, %arg7: memref<1x384xf32, #tpu.memory_space<vmem>>, %arg8: memref<384x128xbf16, #tpu.memory_space<vmem>>, %arg9: memref<1x128xf32, #tpu.memory_space<vmem>>, %arg10: memref<1x1x128xf32, #tpu.memory_space<vmem>>, %arg11: memref<1x1xf32, #tpu.memory_space<vmem>>, %arg12: memref<1x1xf32, #tpu.memory_space<vmem>>) attributes {dimension_semantics = [#tpu.dimension_semantics<parallel>, #tpu.dimension_semantics<arbitrary>], iteration_bounds = array<i64: 1, 1>, scalar_prefetch = 0 : i64, scratch_operands = 2 : i64, tpu.core_type = #tpu.core_type<tc>, window_params = [{transform_indices = @transform_0, window_bounds = array<i64: 16, 32>}, {transform_indices = @transform_1, window_bounds = array<i64: 16, 32>}, {transform_indices = @transform_2, window_bounds = array<i64: 16, 1>}, {pipeline_mode = #tpu.pipeline_mode<synchronous>, transform_indices = @transform_3, window_bounds = array<i64: 1, 128>}, {pipeline_mode = #tpu.pipeline_mode<synchronous>, transform_indices = @transform_4, window_bounds = array<i64: 128, 384>}, {pipeline_mode = #tpu.pipeline_mode<synchronous>, transform_indices = @transform_5, window_bounds = array<i64: 1, 384>}, {pipeline_mode = #tpu.pipeline_mode<synchronous>, transform_indices = @transform_6, window_bounds = array<i64: 384, 128>}, {pipeline_mode = #tpu.pipeline_mode<synchronous>, transform_indices = @transform_7, window_bounds = array<i64: 1, 128>}, {transform_indices = @transform_8, window_bounds = array<i64: 1, 1, 128>}]} {
    %c0_i32 = arith.constant 0 : i32
    %0 = arith.cmpi eq, %arg1, %c0_i32 : i32
    %1 = arith.extui %0 : i1 to i32
    %c0_i32_0 = arith.constant 0 : i32
    %2 = arith.cmpi ne, %1, %c0_i32_0 : i32
    scf.if %2 {
      %cst_35 = arith.constant 0.000000e+00 : f32
      %71 = vector.broadcast %cst_35 : f32 to vector<1x1xf32>
      %c0_36 = arith.constant 0 : index
      %c0_37 = arith.constant 0 : index
      %72 = vector.load %arg11[%c0_36, %c0_37] : memref<1x1xf32, #tpu.memory_space<vmem>>, vector<1x1xf32>
      tpu.vector_store %arg11[%c0_36, %c0_37], %71 {strides = array<i32>} : memref<1x1xf32, #tpu.memory_space<vmem>>, vector<1x1xf32>,
      %cst_38 = arith.constant 0.000000e+00 : f32
      %73 = vector.broadcast %cst_38 : f32 to vector<1x1xf32>
      %c0_39 = arith.constant 0 : index
      %c0_40 = arith.constant 0 : index
      %74 = vector.load %arg12[%c0_39, %c0_40] : memref<1x1xf32, #tpu.memory_space<vmem>>, vector<1x1xf32>
      tpu.vector_store %arg12[%c0_39, %c0_40], %73 {strides = array<i32>} : memref<1x1xf32, #tpu.memory_space<vmem>>, vector<1x1xf32>,
    } else {
    }
    %c0 = arith.constant 0 : index
    %c0_1 = arith.constant 0 : index
    %3 = vector.load %arg2[%c0, %c0_1] : memref<16x32xbf16, #tpu.memory_space<vmem>>, vector<16x32xbf16>
    %4 = arith.extf %3 : vector<16x32xbf16> to vector<16x32xf32>
    %c0_2 = arith.constant 0 : index
    %c0_3 = arith.constant 0 : index
    %5 = vector.load %arg3[%c0_2, %c0_3] : memref<16x32xbf16, #tpu.memory_space<vmem>>, vector<16x32xbf16>
    %6 = arith.extf %5 : vector<16x32xbf16> to vector<16x32xf32>
    %7 = arith.subf %4, %6 : vector<16x32xf32>
    %8 = math.absf %7 : vector<16x32xf32>
    %9 = arith.mulf %4, %6 : vector<16x32xf32>
    %10 = tpu.concatenate %4, %6, %8, %9 in 1 : vector<16x32xf32>, vector<16x32xf32>, vector<16x32xf32>, vector<16x32xf32> -> vector<16x128xf32>
    %11 = arith.truncf %10 : vector<16x128xf32> to vector<16x128xbf16>
    %c0_4 = arith.constant 0 : index
    %c0_5 = arith.constant 0 : index
    %12 = vector.load %arg6[%c0_4, %c0_5] : memref<128x384xbf16, #tpu.memory_space<vmem>>, vector<128x384xbf16>
    %cst = arith.constant dense<0.000000e+00> : vector<16x384xf32>
    %13 = tpu.matmul %11, %12, %cst {dimension_numbers = #tpu.dot_dimension_numbers<[1], [0], [0], [1], [0, 0, 1, 1], [], []>} : vector<16x128xbf16>, vector<128x384xbf16>, vector<16x384xf32> -> vector<16x384xf32>
    %c0_6 = arith.constant 0 : index
    %c0_7 = arith.constant 0 : index
    %14 = vector.load %arg7[%c0_6, %c0_7] : memref<1x384xf32, #tpu.memory_space<vmem>>, vector<1x384xf32>
    %15 = vector.broadcast %14 : vector<1x384xf32> to vector<16x384xf32>
    %16 = arith.addf %13, %15 : vector<16x384xf32>
    %cst_8 = arith.constant 0.000000e+00 : f32
    %17 = vector.broadcast %cst_8 : f32 to vector<16x384xf32>
    %18 = arith.maximumf %16, %17 : vector<16x384xf32>
    %19 = arith.truncf %18 : vector<16x384xf32> to vector<16x384xbf16>
    %c0_9 = arith.constant 0 : index
    %c0_10 = arith.constant 0 : index
    %20 = vector.load %arg8[%c0_9, %c0_10] : memref<384x128xbf16, #tpu.memory_space<vmem>>, vector<384x128xbf16>
    %cst_11 = arith.constant dense<0.000000e+00> : vector<16x128xf32>
    %21 = tpu.matmul %19, %20, %cst_11 {dimension_numbers = #tpu.dot_dimension_numbers<[1], [0], [0], [1], [0, 0, 1, 1], [], []>} : vector<16x384xbf16>, vector<384x128xbf16>, vector<16x128xf32> -> vector<16x128xf32>
    %c0_12 = arith.constant 0 : index
    %c0_13 = arith.constant 0 : index
    %22 = vector.load %arg9[%c0_12, %c0_13] : memref<1x128xf32, #tpu.memory_space<vmem>>, vector<1x128xf32>
    %23 = vector.broadcast %22 : vector<1x128xf32> to vector<16x128xf32>
    %24 = arith.addf %21, %23 : vector<16x128xf32>
    %c0_14 = arith.constant 0 : index
    %c0_15 = arith.constant 0 : index
    %25 = vector.load %arg4[%c0_14, %c0_15] : memref<16x1xi32, #tpu.memory_space<vmem>>, vector<16x1xi32>
    %c0_16 = arith.constant 0 : index
    %c0_17 = arith.constant 0 : index
    %26 = vector.load %arg5[%c0_16, %c0_17] : memref<1x128xf32, #tpu.memory_space<vmem>>, vector<1x128xf32>
    %cst_18 = arith.constant dense<0xFF800000> : vector<16xf32>
    %27 = vector.multi_reduction <maximumf>, %24, %cst_18 [1] : vector<16x128xf32> to vector<16xf32>
    %28 = vector.shape_cast %27 : vector<16xf32> to vector<16x1xf32>
    %29 = vector.broadcast %28 : vector<16x1xf32> to vector<16x128xf32>
    %30 = arith.subf %24, %29 : vector<16x128xf32>
    %31 = math.exp %30 : vector<16x128xf32>
    %cst_19 = arith.constant dense<0.000000e+00> : vector<16xf32>
    %32 = vector.multi_reduction <add>, %31, %cst_19 [1] : vector<16x128xf32> to vector<16xf32>
    %33 = vector.shape_cast %32 : vector<16xf32> to vector<16x1xf32>
    %34 = math.log %33 : vector<16x1xf32>
    %35 = vector.broadcast %34 : vector<16x1xf32> to vector<16x128xf32>
    %36 = arith.subf %30, %35 : vector<16x128xf32>
    %37 = tpu.iota {dimensions = array<i32: 1>} : vector<16x128xi32>
    %38 = vector.broadcast %25 : vector<16x1xi32> to vector<16x128xi32>
    %39 = arith.cmpi eq, %37, %38 : vector<16x128xi32>
    %40 = arith.extui %39 : vector<16x128xi1> to vector<16x128xi32>
    %41 = arith.sitofp %40 : vector<16x128xi32> to vector<16x128xf32>
    %42 = arith.mulf %36, %41 : vector<16x128xf32>
    %cst_20 = arith.constant dense<0.000000e+00> : vector<16xf32>
    %43 = vector.multi_reduction <add>, %42, %cst_20 [1] : vector<16x128xf32> to vector<16xf32>
    %44 = vector.shape_cast %43 : vector<16xf32> to vector<16x1xf32>
    %cst_21 = arith.constant 0.000000e+00 : f32
    %45 = vector.broadcast %cst_21 : f32 to vector<16x1xf32>
    %46 = arith.subf %45, %44 : vector<16x1xf32>
    %47 = vector.broadcast %26 : vector<1x128xf32> to vector<16x128xf32>
    %48 = arith.mulf %47, %41 : vector<16x128xf32>
    %cst_22 = arith.constant dense<0.000000e+00> : vector<16xf32>
    %49 = vector.multi_reduction <add>, %48, %cst_22 [1] : vector<16x128xf32> to vector<16xf32>
    %50 = vector.shape_cast %49 : vector<16xf32> to vector<16x1xf32>
    %51 = arith.mulf %50, %46 : vector<16x1xf32>
    %52 = vector.shape_cast %51 : vector<16x1xf32> to vector<1x16x1xf32>
    %cst_23 = arith.constant dense<0.000000e+00> : vector<1xf32>
    %53 = vector.multi_reduction <add>, %52, %cst_23 [1, 2] : vector<1x16x1xf32> to vector<1xf32>
    %54 = vector.shape_cast %53 : vector<1xf32> to vector<1x1x1xf32>
    %55 = vector.extract %54[0, 0, 0] : f32 from vector<1x1x1xf32>
    %56 = vector.broadcast %55 : f32 to vector<1x1xf32>
    %57 = vector.shape_cast %50 : vector<16x1xf32> to vector<1x16x1xf32>
    %cst_24 = arith.constant dense<0.000000e+00> : vector<1xf32>
    %58 = vector.multi_reduction <add>, %57, %cst_24 [1, 2] : vector<1x16x1xf32> to vector<1xf32>
    %59 = vector.shape_cast %58 : vector<1xf32> to vector<1x1x1xf32>
    %60 = vector.extract %59[0, 0, 0] : f32 from vector<1x1x1xf32>
    %61 = vector.broadcast %60 : f32 to vector<1x1xf32>
    %c0_25 = arith.constant 0 : index
    %c0_26 = arith.constant 0 : index
    %62 = vector.load %arg11[%c0_25, %c0_26] : memref<1x1xf32, #tpu.memory_space<vmem>>, vector<1x1xf32>
    %63 = arith.addf %62, %56 : vector<1x1xf32>
    %c0_27 = arith.constant 0 : index
    %c0_28 = arith.constant 0 : index
    %64 = vector.load %arg11[%c0_27, %c0_28] : memref<1x1xf32, #tpu.memory_space<vmem>>, vector<1x1xf32>
    tpu.vector_store %arg11[%c0_27, %c0_28], %63 {strides = array<i32>} : memref<1x1xf32, #tpu.memory_space<vmem>>, vector<1x1xf32>,
    %c0_29 = arith.constant 0 : index
    %c0_30 = arith.constant 0 : index
    %65 = vector.load %arg12[%c0_29, %c0_30] : memref<1x1xf32, #tpu.memory_space<vmem>>, vector<1x1xf32>
    %66 = arith.addf %65, %61 : vector<1x1xf32>
    %c0_31 = arith.constant 0 : index
    %c0_32 = arith.constant 0 : index
    %67 = vector.load %arg12[%c0_31, %c0_32] : memref<1x1xf32, #tpu.memory_space<vmem>>, vector<1x1xf32>
    tpu.vector_store %arg12[%c0_31, %c0_32], %66 {strides = array<i32>} : memref<1x1xf32, #tpu.memory_space<vmem>>, vector<1x1xf32>,
    %c0_i32_33 = arith.constant 0 : i32
    %68 = arith.cmpi eq, %arg1, %c0_i32_33 : i32
    %69 = arith.extui %68 : i1 to i32
    %c0_i32_34 = arith.constant 0 : i32
    %70 = arith.cmpi ne, %69, %c0_i32_34 : i32
    scf.if %70 {
      %71 = tpu.iota {dimensions = array<i32: 2>} : vector<1x1x128xi32>
      %c0_i32_35 = arith.constant 0 : i32
      %72 = vector.broadcast %c0_i32_35 : i32 to vector<1x1x128xi32>
      %73 = arith.cmpi eq, %71, %72 : vector<1x1x128xi32>
      %c0_36 = arith.constant 0 : index
      %c0_37 = arith.constant 0 : index
      %74 = vector.load %arg11[%c0_36, %c0_37] : memref<1x1xf32, #tpu.memory_space<vmem>>, vector<1x1xf32>
      %c1_i32 = arith.constant 1 : i32
      %75 = vector.broadcast %c1_i32 : i32 to vector<1x1x128xi32>
      %76 = arith.cmpi eq, %71, %75 : vector<1x1x128xi32>
      %c0_38 = arith.constant 0 : index
      %c0_39 = arith.constant 0 : index
      %77 = vector.load %arg12[%c0_38, %c0_39] : memref<1x1xf32, #tpu.memory_space<vmem>>, vector<1x1xf32>
      %cst_40 = arith.constant 0.000000e+00 : f32
      %78 = vector.shape_cast %77 : vector<1x1xf32> to vector<1x1x1xf32>
      %79 = vector.broadcast %78 : vector<1x1x1xf32> to vector<1x1x128xf32>
      %80 = vector.broadcast %cst_40 : f32 to vector<1x1x128xf32>
      %81 = arith.select %76, %79, %80 : vector<1x1x128xi1>, vector<1x1x128xf32>
      %82 = vector.shape_cast %74 : vector<1x1xf32> to vector<1x1x1xf32>
      %83 = vector.broadcast %82 : vector<1x1x1xf32> to vector<1x1x128xf32>
      %84 = arith.select %73, %83, %81 : vector<1x1x128xi1>, vector<1x1x128xf32>
      %c0_41 = arith.constant 0 : index
      %c0_42 = arith.constant 0 : index
      %c0_43 = arith.constant 0 : index
      %85 = vector.load %arg10[%c0_41, %c0_42, %c0_43] : memref<1x1x128xf32, #tpu.memory_space<vmem>>, vector<1x1x128xf32>
      tpu.vector_store %arg10[%c0_41, %c0_42, %c0_43], %84 {strides = array<i32>} : memref<1x1x128xf32, #tpu.memory_space<vmem>>, vector<1x1x128xf32>,
    } else {
    }
    return
  }
  func.func @transform_0(%arg0: i32, %arg1: i32) -> (i32, i32) {
    %c1_i32 = arith.constant 1 : i32
    %0 = arith.muli %arg0, %c1_i32 : i32
    %1 = arith.addi %0, %arg1 : i32
    %c0_i32 = arith.constant 0 : i32
    %c0_i32_0 = arith.constant 0 : i32
    return %1, %c0_i32 : i32, i32
  }
  func.func @transform_1(%arg0: i32, %arg1: i32) -> (i32, i32) {
    %c1_i32 = arith.constant 1 : i32
    %0 = arith.muli %arg0, %c1_i32 : i32
    %1 = arith.addi %0, %arg1 : i32
    %c0_i32 = arith.constant 0 : i32
    %c0_i32_0 = arith.constant 0 : i32
    return %1, %c0_i32 : i32, i32
  }
  func.func @transform_2(%arg0: i32, %arg1: i32) -> (i32, i32) {
    %c1_i32 = arith.constant 1 : i32
    %0 = arith.muli %arg0, %c1_i32 : i32
    %1 = arith.addi %0, %arg1 : i32
    %c0_i32 = arith.constant 0 : i32
    %c0_i32_0 = arith.constant 0 : i32
    return %1, %c0_i32 : i32, i32
  }
  func.func @transform_3(%arg0: i32, %arg1: i32) -> (i32, i32) {
    %c0_i32 = arith.constant 0 : i32
    %c0_i32_0 = arith.constant 0 : i32
    %c0_i32_1 = arith.constant 0 : i32
    return %c0_i32, %c0_i32_0 : i32, i32
  }
  func.func @transform_4(%arg0: i32, %arg1: i32) -> (i32, i32) {
    %c0_i32 = arith.constant 0 : i32
    %c0_i32_0 = arith.constant 0 : i32
    %c0_i32_1 = arith.constant 0 : i32
    return %c0_i32, %c0_i32_0 : i32, i32
  }
  func.func @transform_5(%arg0: i32, %arg1: i32) -> (i32, i32) {
    %c0_i32 = arith.constant 0 : i32
    %c0_i32_0 = arith.constant 0 : i32
    %c0_i32_1 = arith.constant 0 : i32
    return %c0_i32, %c0_i32_0 : i32, i32
  }
  func.func @transform_6(%arg0: i32, %arg1: i32) -> (i32, i32) {
    %c0_i32 = arith.constant 0 : i32
    %c0_i32_0 = arith.constant 0 : i32
    %c0_i32_1 = arith.constant 0 : i32
    return %c0_i32, %c0_i32_0 : i32, i32
  }
  func.func @transform_7(%arg0: i32, %arg1: i32) -> (i32, i32) {
    %c0_i32 = arith.constant 0 : i32
    %c0_i32_0 = arith.constant 0 : i32
    %c0_i32_1 = arith.constant 0 : i32
    return %c0_i32, %c0_i32_0 : i32, i32
  }
  func.func @transform_8(%arg0: i32, %arg1: i32) -> (i32, i32, i32) {
    %c0_i32 = arith.constant 0 : i32
    %c0_i32_0 = arith.constant 0 : i32
    %c0_i32_1 = arith.constant 0 : i32
    return %arg0, %c0_i32, %c0_i32_0 : i32, i32, i32
  }
}

</mosaic_0001>

<bundles_post_ra>
// kernel: tpu_custom_call.1
= control target key start
LH: loop header
LB: loop body
LE: loop exit
PB: predicated region body
PF: predicated region fallthrough
CT: control target
= control target key end

     0   :  { %13 = vsyncpa [#allocation5], 0  ;;  %s1363_s0 = inlined_call_operand.vmem [shape: bf16[16,32], index: 0, kind: input, shape index: {}]   ;;  %s1364_s1 = inlined_call_operand.vmem [shape: bf16[16,32], index: 1, kind: input, shape index: {}]   ;;  %s1365_s2 = inlined_call_operand.vmem [shape: s32[16,1], index: 2, kind: input, shape index: {}]   ;;  %s1366_s3 = inlined_call_operand.vmem [shape: f32[1,128], index: 3, kind: input, shape index: {}]   ;;  %s1367_s4 = inlined_call_operand.hbm [shape: bf16[128,384], index: 4, kind: input, shape index: {}]   ;;  %s1368_s5 = inlined_call_operand.vmem [shape: f32[1,384], index: 5, kind: input, shape index: {}]   ;;  %s1369_s6 = inlined_call_operand.hbm [shape: bf16[384,128], index: 6, kind: input, shape index: {}]   ;;  %s1370_s7 = inlined_call_operand.vmem [shape: f32[1,128], index: 7, kind: input, shape index: {}]   ;;  %s1371_s8 = inlined_call_operand.hbm [shape: f32[1,1,128], index: 8, kind: output, shape index: {}]  }
   0x1   :  { %14 = vsyncpa [#allocation8], 0 }
   0x2   :  { %15 = vsyncpa [#allocation6], 0  ;;  %s1195_s27 = smov [#allocation4]   ;;  %s1123_s9 = scalar_lea.hbm %s1367_s4, 3072 }
   0x3   :  { %s53_s28 = sshll.u32 %s1195_s27, 4  ;;  %p1124_p0 = scmp.ne.s32.totalorder %s1367_s4, %s1123_s9  ;;  %s54_s28 = int_to_ptr.vmem [resolvable:$true] %s53_s28 }
   0x4   :  { %p1127_p1 = scmp.lt.u32.totalorder %s1123_s9, %s1367_s4 }
   0x6   :  { %p1129_p2 = pnand %p1127_p1, %p1124_p0 }
   0x8   :  { %1132 = shalt.err (!%p1129_p2)
}
   0x9   :  { %s1133_s14 = scalar_lea.vmem %s54_s28, 3072  ;;  %p1138_p4 = scmp.lt.s32.totalorder %s54_s28, %s54_s28 }
   0xa   :  { %p1134_p3 = scmp.ne.s32.totalorder %s54_s28, %s1133_s14  ;;  %p1139_p5 = scmp.lt.s32.totalorder %s1133_s14, %s1133_s14 }
   0xc   :  { %p1140_p6 = por %p1139_p5, %p1138_p4 }
   0xe   :  { %p1141_p7 = pnand %p1140_p6, %p1134_p3 }
  0x10   :  { %1144 = shalt.err (!%p1141_p7)
}
  0x11   :  { %s1196_s15 = smov 192   ;;  %s1197_s16 = smov 12  }
  0x12   :  { %59 = dma.hbm_to_vmem [thread:$0]  %s1367_s4, 3072, %s54_s28, [#allocation5], %s1196_s15, %s1196_s15, %s1197_s16  }
  0x13   :  { %s1198_s19 = smov [#allocation7]   ;;  %s1145_s23 = scalar_lea.hbm %s1369_s6, 3072 }
  0x14   :  { %s67_s20 = sshll.u32 %s1198_s19, 4  ;;  %p1146_p8 = scmp.ne.s32.totalorder %s1369_s6, %s1145_s23  ;;  %s68_s20 = int_to_ptr.vmem [resolvable:$true] %s67_s20 }
  0x15   :  { %p1149_p9 = scmp.lt.u32.totalorder %s1145_s23, %s1369_s6 }
  0x17   :  { %p1151_p10 = pnand %p1149_p9, %p1146_p8 }
  0x19   :  { %1154 = shalt.err (!%p1151_p10)
}
  0x1a   :  { %s1155_s29 = scalar_lea.vmem %s68_s20, 3072  ;;  %p1160_p12 = scmp.lt.s32.totalorder %s68_s20, %s68_s20 }
  0x1b   :  { %p1156_p11 = scmp.ne.s32.totalorder %s68_s20, %s1155_s29  ;;  %p1161_p13 = scmp.lt.s32.totalorder %s1155_s29, %s1155_s29 }
  0x1d   :  { %p1162_p0 = por %p1161_p13, %p1160_p12 }
  0x1f   :  { %p1163_p1 = pnand %p1162_p0, %p1156_p11 }
  0x21   :  { %1166 = shalt.err (!%p1163_p1)
}
  0x22   :  { %s1199_s4 = smov 64   ;;  %s1200_s28 = smov 4  }
  0x23   :  { %73 = dma.hbm_to_vmem [thread:$0]  %s1369_s6, 3072, %s68_s20, [#allocation8], %s1199_s4, %s1199_s4, %s1200_s28  }
  0x24   :  { %1189 = dma.done.wait [#allocation5], 3072  }
  0x25   :  { %1190 = vsyncadd [#allocation5], 4294964224 }
  0x26   :  { %1191 = dma.done.wait [#allocation8], 3072  }
  0x27   :  { %1192 = vsyncadd [#allocation8], 4294964224  ;;  %v1201_v0 = vmov 0.0   ;;  %v1202_v1 = vmov 0   ;;  %vm1203_vm0 = vmmov 0   ;;  %v943_v2 = vld [vmem:[%s1364_s1] sm:$0xff]  }
  0x28   :  { %986 = vmatprep.subr.bf16.mxu1 %v1201_v0  ;;  %389 = vmatprep.mubr.bf16.mxu0 %v1202_v1  ;;  %v939_v3 = vld [vmem:[%s1363_s0] sm:$0xff]   ;;  %v944_v4 = vunpack.c.l.bf16 %v943_v2  ;;  %v945_v5 = vunpack.c.h.bf16 %v943_v2  ;;  %v1062_v10 = vld [vmem:[#allocation4 + $0x8] ss:$12 sps:$4 sm:$0xff]   ;;  %s1204_s0 = smov 32   ;;  %s1205_s1 = smov 96   ;;  %vm170_vm1 = vcmask 261120  }
  0x29   :  { %1002 = vmatprep.mubr.msk.bf16.mxu1 %vm1203_vm0, %v1201_v0  ;;  %1057 = vset.pattern.permute.xlu0 %v1202_v1  ;;  %v1287_v6 = vunpack.c.l.bf16 %v939_v3  ;;  %v1289_v7 = vunpack.c.h.bf16 %v939_v3  ;;  %v1059_v8 = vld [vmem:[#allocation4 + $0x4] ss:$12 sps:$4 sm:$0xff]   ;;  %v1061_v9 = vld [vmem:[#allocation4] ss:$12 sps:$4 sm:$0xff]   ;;  %v1063_v15 = vld [vmem:[#allocation4 + $0x1c] ss:$12 sps:$4 sm:$0xff]  }
  0x2a   :  { %1058 = vset.pattern.permute.xlu1 %v1202_v1  ;;  %v1042_v11 = vpack.i.bf16 %v945_v5, %v944_v4  ;;  %357 = vmatprep.subr.bf16.mxu0 %v1059_v8  ;;  %v1065_v17 = vld [vmem:[#allocation4 + $0x18] ss:$12 sps:$4 sm:$0xff]   ;;  %v1066_v20 = vld [vmem:[#allocation4 + $0x20] ss:$12 sps:$4 sm:$0xff]   ;;  %v1069_v24 = vld [vmem:[#allocation4 + $0x30] ss:$12 sps:$4 sm:$0xff]  }
  0x2b   :  { %v140_v12 = vsub.f32 %v1287_v6, %v944_v4  ;;  %v141_v13 = vsub.f32 %v1289_v7, %v945_v5  ;;  %v144_v14 = vmul.f32 %v944_v4, %v1287_v6  ;;  %v145_v16 = vmul.f32 %v945_v5, %v1289_v7  ;;  %358 = vmatpush1.bf16.msra.mxu0 %v1061_v9  ;;  %v1067_v22 = vld [vmem:[#allocation4 + $0x34] ss:$12 sps:$4 sm:$0xff]   ;;  %v1070_v25 = vld [vmem:[#allocation4 + $0x38] ss:$12 sps:$4 sm:$0xff]   ;;  %v1074_v28 = vld [vmem:[#allocation4 + $0x50] ss:$12 sps:$4 sm:$0xff]  }
  0x2c   :  { %987 = vmatpush3.bf16.msra.mxu1 %v1062_v10  ;;  %1043 = vrot.lane.b32.xlu0 %v1042_v11, %s1204_s0  ;;  %v1071_v26 = vld [vmem:[#allocation4 + $0x4c] ss:$12 sps:$4 sm:$0xff]   ;;  %v1073_v27 = vld [vmem:[#allocation4 + $0x48] ss:$12 sps:$4 sm:$0xff]   ;;  %v1075_v29 = vld [vmem:[#allocation4 + $0x64] ss:$12 sps:$4 sm:$0xff]  }
  0x2d   :  { %v142_v18 = vand.u32 2147483647, %v140_v12  ;;  %v143_v19 = vand.u32 2147483647, %v141_v13  ;;  %359 = vmatprep.subr.bf16.mxu0 %v1063_v15  ;;  %v1052_v21 = vpack.i.bf16 %v145_v16, %v144_v14  ;;  %988 = vmatprep.subr.bf16.mxu1 %v1201_v0  ;;  %v1077_v30 = vld [vmem:[#allocation4 + $0x60] ss:$12 sps:$4 sm:$0xff]  }
  0x2e   :  { %v1078_v31 = vld [vmem:[#allocation4 + $0x68] ss:$12 sps:$4 sm:$0xff]   ;;  %v1081_v33 = vld [vmem:[#allocation4 + $0x78] ss:$12 sps:$4 sm:$0xff]   ;;  %v1082_v34 = vld [vmem:[#allocation4 + $0x80] ss:$12 sps:$4 sm:$0xff]  }
  0x2f   :  { %v1047_v23 = vpack.i.bf16 %v143_v19, %v142_v18  ;;  %1053 = vrot.lane.b32.xlu1 %v1052_v21, %s1205_s1  ;;  %360 = vmatpush1.bf16.msra.mxu0 %v1065_v17  ;;  %v1079_v32 = vld [vmem:[#allocation4 + $0x7c] ss:$12 sps:$4 sm:$0xff]   ;;  %v1083_v35 = vld [vmem:[#allocation4 + $0x94] ss:$12 sps:$4 sm:$0xff]   ;;  %v1086_v37 = vld [vmem:[#allocation4 + $0x98] ss:$12 sps:$4 sm:$0xff]   ;;  %v214_v18 = vlaneseq }
  0x30   :  { %989 = vmatpush3.bf16.msra.mxu1 %v1066_v20  ;;  %361 = vmatprep.subr.bf16.mxu0 %v1067_v22  ;;  %v1085_v36 = vld [vmem:[#allocation4 + $0x90] ss:$12 sps:$4 sm:$0xff]   ;;  %v1087_v38 = vld [vmem:[#allocation4 + $0xac] ss:$12 sps:$4 sm:$0xff]   ;;  %v1089_v39 = vld [vmem:[#allocation4 + $0xa8] ss:$12 sps:$4 sm:$0xff]  }
  0x31   :  { %1048 = vrot.lane.b32.xlu0 %v1047_v23, %s1199_s4  ;;  %990 = vmatprep.subr.bf16.mxu1 %v1201_v0  ;;  %v1090_v40 = vld [vmem:[#allocation4 + $0xb0] ss:$12 sps:$4 sm:$0xff]   ;;  %v1092_v41 = vld [vmem:[#allocation7 + $0x40] sm:$0xff]   ;;  %vm173_vm2 = vcmask 523264   ;;  %vm176_vm3 = vcmask 785408   ;;  %v1095_v60 = vld [vmem:[#allocation7 + $0x48] sm:$0xff]  }
  0x32   :  { %v1091_v57 = vld [vmem:[#allocation7 + $0x80] sm:$0xff]   ;;  %v1094_v61 = vld [vmem:[#allocation7 + $0x88] sm:$0xff]   ;;  %v1098_v63 = vld [vmem:[#allocation7 + $0x50] sm:$0xff]   ;;  %v215_v19 = vshrl.u32 %v214_v18, 7  ;;  %vm790_vm6 = vcmask 7168   ;;  %vm129_vm7 = vcmask 0  }
  0x33   :  { %362 = vmatpush1.bf16.msra.mxu0 %v1069_v24  ;;  %v1093_v58 = vld [vmem:[#allocation7] sm:$0xff]   ;;  %v1096_v62 = vld [vmem:[#allocation7 + $0x8] sm:$0xff]   ;;  %v1097_v1 = vld [vmem:[#allocation7 + $0x90] sm:$0xff]   ;;  %130 = vst.msk [vmem:[#allocation2] sm:$0x1] %vm129_vm7, %v1201_v0  ;;  %s1206_s21 = smov [#allocation9]  }
  0x34   :  { %991 = vmatpush3.bf16.msra.mxu1 %v1070_v25  ;;  %363 = vmatprep.subr.bf16.mxu0 %v1071_v26  ;;  %v1099_v2 = vld [vmem:[#allocation7 + $0x10] sm:$0xff]   ;;  %v1101_v3 = vld [vmem:[#allocation7 + $0x58] sm:$0xff]   ;;  %v1105_v8 = vld [vmem:[#allocation7 + $0x20] sm:$0xff]   ;;  %v1316_v20 = vsub.s32 0, %v215_v19  ;;  %v224_v21 = vsub.s32 2, %v215_v19  ;;  %v220_v23 = vsub.s32 1, %v215_v19 }
  0x35   :  { %992 = vmatprep.subr.bf16.mxu1 %v1201_v0  ;;  %v1100_v4 = vld [vmem:[#allocation7 + $0x98] sm:$0xff]   ;;  %v1107_v9 = vld [vmem:[#allocation7 + $0x68] sm:$0xff]   ;;  %v1109_v12 = vld [vmem:[#allocation7 + $0xb0] sm:$0xff]   ;;  %131 = vst.msk [vmem:[#allocation3] sm:$0x1] %vm129_vm7, %v1201_v0  ;;  %s858_s22 = sshll.u32 %s1206_s21, 4  ;;  %s859_s22 = int_to_ptr.vmem [resolvable:$true] %s858_s22 }
  0x36   :  { %v1102_v5 = vld [vmem:[#allocation7 + $0x18] sm:$0xff]   ;;  %v1106_v10 = vld [vmem:[#allocation7 + $0xa8] sm:$0xff]   ;;  %v1110_v13 = vld [vmem:[#allocation7 + $0x70] sm:$0xff]   ;;  %s1167_s23 = scalar_lea.vmem %s859_s22, 16  ;;  %s1171_s24 = scalar_lea.vmem %s859_s22, 32 }
  0x37   :  { %364 = vmatpush1.bf16.msra.mxu0 %v1073_v27  ;;  %v1108_v11 = vld [vmem:[#allocation7 + $0x28] sm:$0xff]   ;;  %v1111_v14 = vld [vmem:[#allocation7 + $0x30] sm:$0xff]   ;;  %v1112_v15 = vld [vmem:[#allocation7 + $0xb8] sm:$0xff]   ;;  %p1168_p2 = scmp.ne.s32.totalorder %s859_s22, %s1167_s23  ;;  %p1172_p3 = scmp.lt.s32.totalorder %s859_s22, %s859_s22 }
  0x38   :  { %993 = vmatpush3.bf16.msra.mxu1 %v1074_v28  ;;  %365 = vmatprep.subr.bf16.mxu0 %v1075_v29  ;;  %v1113_v16 = vld [vmem:[#allocation7 + $0x78] sm:$0xff]   ;;  %p1173_p4 = scmp.lt.s32.totalorder %s1171_s24, %s1167_s23 }
  0x39   :  { %994 = vmatprep.subr.bf16.mxu1 %v1201_v0  ;;  %v1114_v17 = vld [vmem:[#allocation7 + $0x38] sm:$0xff]  }
  0x3a   :  { %v212_v22 = vld [vmem:[%s1368_s5] sm:$0x7]  ;;  %p1174_p5 = por %p1173_p4, %p1172_p3 }
  0x3b   :  { %366 = vmatpush1.bf16.msra.mxu0 %v1077_v30  ;;  %v217_v24 = vrot.slane %v212_v22, %v1316_v20  ;;  %v225_v25 = vrot.slane %v212_v22, %v224_v21  ;;  %v221_v26 = vrot.slane %v212_v22, %v220_v23 }
  0x3c   :  { %995 = vmatpush3.bf16.msra.mxu1 %v1078_v31  ;;  %367 = vmatprep.subr.bf16.mxu0 %v1079_v32  ;;  %p1175_p6 = pnand %p1174_p5, %p1168_p2 }
  0x3d   :  { %996 = vmatprep.subr.bf16.mxu1 %v1201_v0 }
  0x3f   :  { %368 = vmatpush1.bf16.msra.mxu0 %v1081_v33 }
  0x40   :  { %997 = vmatpush3.bf16.msra.mxu1 %v1082_v34  ;;  %369 = vmatprep.subr.bf16.mxu0 %v1083_v35 }
  0x41   :  { %998 = vmatprep.subr.bf16.mxu1 %v1201_v0 }
  0x43   :  { %370 = vmatpush1.bf16.msra.mxu0 %v1085_v36 }
  0x44   :  { %999 = vmatpush3.bf16.msra.mxu1 %v1086_v37  ;;  %371 = vmatprep.subr.bf16.mxu0 %v1087_v38 }
  0x45   :  { %1000 = vmatprep.subr.bf16.mxu1 %v1201_v0 }
  0x47   :  { %372 = vmatpush1.bf16.msra.mxu0 %v1089_v39 }
  0x48   :  { %1001 = vmatpush3.bf16.msra.mxu1 %v1090_v40  ;;  %955 = vmatprep.subr.bf16.mxu0 %v1092_v41 }
  0x49   :  { %1006 = vmatprep.subr.bf16.mxu1 %v1201_v0 }
  0x9e   :  { %v1044_v42 = vpop.permute.xlu0 %1043 }
  0x9f   :  { %v1046_v43 = vunpack.i.h.bf16 %v1044_v42  ;;  %v1045_v44 = vunpack.i.l.bf16 %v1044_v42 }
  0xa1   :  { %v1054_v45 = vpop.permute.xlu1 %1053  ;;  %v171_v51 = vsel %vm170_vm1, %v1287_v6, %v1045_v44  ;;  %v172_v52 = vsel %vm170_vm1, %v1289_v7, %v1046_v43  ;;  %v1104_v6 = vld [vmem:[#allocation7 + $0x60] sm:$0xff]  }
  0xa2   :  { %v1056_v47 = vunpack.i.h.bf16 %v1054_v45  ;;  %v1055_v48 = vunpack.i.l.bf16 %v1054_v45  ;;  %v1103_v7 = vld [vmem:[#allocation7 + $0xa0] sm:$0xff]  }
  0xa3   :  { %v1049_v46 = vpop.permute.xlu0 %1048 }
  0xa4   :  { %v1051_v49 = vunpack.i.h.bf16 %v1049_v46  ;;  %v1050_v50 = vunpack.i.l.bf16 %v1049_v46 }
  0xa6   :  { %v175_v53 = vsel %vm173_vm2, %v172_v52, %v1051_v49  ;;  %v174_v54 = vsel %vm173_vm2, %v171_v51, %v1050_v50 }
  0xa7   :  { %v177_v55 = vsel %vm176_vm3, %v174_v54, %v1055_v48  ;;  %v178_v56 = vsel %vm176_vm3, %v175_v53, %v1056_v47  ;;  %v910_v54 = vld [vmem:[%s1370_s7] ss:$0 sm:$0xff] }
  0xa8   :  { %v179_v59 = vpack.c.bf16 %v178_v56, %v177_v55 }
  0xaa   :  { %390 = vmatmul.mubr.bf16.vlgmr.msra.gmra.mrb[0].mxu0 %v179_v59  ;;  %1003 = vmatmul.mubr.bf16.vlgmr.msra.gmra.mrb[0].mxu1 %v179_v59 }
  0xab   :  { %1007 = vmatpush3.bf16.msra.mxu1 %v1091_v57  ;;  %956 = vmatpush3.bf16.msra.mxu0 %v1093_v58 }
  0xac   :  { %1008 = vmatprep.subr.bf16.mxu1 %v1201_v0  ;;  %957 = vmatprep.subr.bf16.mxu0 %v1095_v60 }
  0xad   :  { %1022 = vmatprep.mubr.msk.bf16.mxu1 %vm1203_vm0, %v1201_v0 }
  0xaf   :  { %1009 = vmatpush3.bf16.msra.mxu1 %v1094_v61  ;;  %958 = vmatpush3.bf16.msra.mxu0 %v1096_v62 }
  0xb0   :  { %1010 = vmatprep.subr.bf16.mxu1 %v1201_v0  ;;  %959 = vmatprep.subr.bf16.mxu0 %v1098_v63 }
  0xb3   :  { %1011 = vmatpush3.bf16.msra.mxu1 %v1097_v1  ;;  %960 = vmatpush3.bf16.msra.mxu0 %v1099_v2 }
  0xb4   :  { %1012 = vmatprep.subr.bf16.mxu1 %v1201_v0  ;;  %961 = vmatprep.subr.bf16.mxu0 %v1101_v3 }
  0xb7   :  { %1013 = vmatpush3.bf16.msra.mxu1 %v1100_v4  ;;  %962 = vmatpush3.bf16.msra.mxu0 %v1102_v5 }
  0xb8   :  { %1014 = vmatprep.subr.bf16.mxu1 %v1201_v0  ;;  %963 = vmatprep.subr.bf16.mxu0 %v1104_v6 }
  0xbb   :  { %1015 = vmatpush3.bf16.msra.mxu1 %v1103_v7  ;;  %964 = vmatpush3.bf16.msra.mxu0 %v1105_v8 }
  0xbc   :  { %1016 = vmatprep.subr.bf16.mxu1 %v1201_v0  ;;  %965 = vmatprep.subr.bf16.mxu0 %v1107_v9 }
  0xbf   :  { %1017 = vmatpush3.bf16.msra.mxu1 %v1106_v10  ;;  %966 = vmatpush3.bf16.msra.mxu0 %v1108_v11  ;;  %v732_v10 = vld [vmem:[%s1365_s2 + $0x8] sm:$0xff]  ;;  %v731_v11 = vld [vmem:[%s1365_s2] sm:$0xff] }
  0xc0   :  { %1018 = vmatprep.subr.bf16.mxu1 %v1201_v0  ;;  %967 = vmatprep.subr.bf16.mxu0 %v1110_v13 }
  0xc3   :  { %1019 = vmatpush3.bf16.msra.mxu1 %v1109_v12  ;;  %968 = vmatpush3.bf16.msra.mxu0 %v1111_v14  ;;  %v1332_v14 = vand.u32 127, %v214_v18  ;;  %v937_v18 = vld [vmem:[%s1366_s3] ss:$0 sm:$0xff] }
  0xc4   :  { %1020 = vmatprep.subr.bf16.mxu1 %v1201_v0  ;;  %969 = vmatprep.subr.bf16.mxu0 %v1113_v16 }
  0xc5   :  { %vm829_vm8 = vcmp.eq.s32.totalorder %v1332_v14, 1  ;;  %vm827_vm9 = vcmp.eq.s32.totalorder %v1332_v14, 0 }
  0xc7   :  { %1021 = vmatpush3.bf16.msra.mxu1 %v1112_v15  ;;  %970 = vmatpush3.bf16.msra.mxu0 %v1114_v17 }
 0x17d   :  { %v391_v27 = vpop.f32.mrb[0].mxu0  ;;  %v434_v28 = vpop.f32.mrb[0].mxu1 }
 0x17e   :  { %v392_v29 = vadd.f32 %v391_v27, %v217_v24  ;;  %v435_v30 = vadd.f32 %v434_v28, %v225_v25  ;;  %v393_v31 = vpop.f32.mrb[1].mxu0  ;;  %v1004_v32 = vpop.f32.mrb[1].mxu1 }
 0x17f   :  { %v394_v33 = vadd.f32 %v393_v31, %v221_v26  ;;  %v395_v34 = vpop.f32.mrb[2].mxu0  ;;  %v437_v35 = vpop.f32.mrb[2].mxu1 }
 0x180   :  { %v396_v36 = vadd.f32 %v395_v34, %v217_v24  ;;  %v438_v37 = vadd.f32 %v437_v35, %v225_v25  ;;  %v397_v38 = vpop.f32.mrb[3].mxu0  ;;  %v1005_v39 = vpop.f32.mrb[3].mxu1  ;;  %v441_v41 = vmax.f32 %v392_v29, 0.0  ;;  %v443_v42 = vmax.f32 %v435_v30, 0.0 }
 0x181   :  { %v398_v40 = vadd.f32 %v397_v38, %v221_v26  ;;  %v442_v45 = vmax.f32 %v394_v33, 0.0 }
 0x182   :  { %v444_v43 = vmax.f32 %v396_v36, 0.0  ;;  %v446_v44 = vmax.f32 %v438_v37, 0.0 }
 0x183   :  { %v445_v46 = vmax.f32 %v398_v40, 0.0 }
 0x184   :  { %v447_v47 = vpack.c.bf16 %v444_v43, %v441_v41  ;;  %v449_v48 = vpack.c.bf16 %v446_v44, %v443_v42 }
 0x185   :  { %v448_v49 = vpack.c.bf16 %v445_v46, %v442_v45 }
 0x186   :  { %1023 = vmatmul.mubr.bf16.vlgmr.msra.gmra.mrb[4].mxu1 %v449_v48 }
 0x187   :  { %681 = vmatprep.mubr.bf16.mxu0 %v448_v49 }
 0x188   :  { %682 = vmatmul.mubr.bf16.vlgmr.msra.gmra.mrb[4].mxu0 %v447_v47 }
 0x259   :  { %v724_v50 = vpop.f32.mrb[4].mxu1 }
 0x25a   :  { %v1024_v51 = vpop.f32.mrb[5].mxu1 }
 0x25b   :  { %v971_v52 = vpop.f32.mrb[4].mxu0  ;;  %v727_v53 = vpop.f32.mrb[6].mxu1 }
 0x25c   :  { %v972_v55 = vpop.f32.mrb[5].mxu0  ;;  %v1025_v56 = vpop.f32.mrb[7].mxu1 }
 0x25d   :  { %v973_v57 = vadd.f32 %v972_v55, %v971_v52  ;;  %v974_v58 = vpop.f32.mrb[6].mxu0 }
 0x25e   :  { %v975_v59 = vpop.f32.mrb[7].mxu0 }
 0x25f   :  { %v684_v60 = vadd.f32 %v973_v57, %v910_v54  ;;  %v976_v61 = vadd.f32 %v975_v59, %v974_v58  ;;  %v817_v59 = vld [vmem:[#allocation2] sm:$0x1] }
 0x261   :  { %v687_v62 = vadd.f32 %v976_v61, %v910_v54  ;;  %v725_v63 = vadd.f32 %v724_v50, %v684_v60  ;;  %v821_v61 = vld [vmem:[#allocation3] sm:$0x1] }
 0x263   :  { %734 = vmax.xlane.f32.xlu1 %v725_v63  ;;  %v728_v1 = vadd.f32 %v727_v53, %v687_v62 }
 0x265   :  { %736 = vmax.xlane.f32.xlu0 %v728_v1 }
 0x2f0   :  { %v735_v2 = vpop.xlane.xlu1 %734 }
 0x2f1   :  { %v738_v3 = vsub.f32 %v725_v63, %v735_v2 }
 0x2f2   :  { %v737_v4 = vpop.xlane.xlu0 %736 }
 0x2f3   :  { %v740_v5 = vmul.f32 1.442695, %v738_v3  ;;  %v739_v6 = vsub.f32 %v728_v1, %v737_v4 }
 0x2f5   :  { %1115 = vpow2.f32 %v740_v5  ;;  %v742_v7 = vmul.f32 1.442695, %v739_v6 }
 0x2f7   :  { %1117 = vpow2.f32 %v742_v7 }
 0x2ff   :  { %v1116_v8 = vpop.eup %1115 }
 0x300   :  { %744 = vadd.xlane.f32.xlu0 %v1116_v8 }
 0x301   :  { %v1118_v9 = vpop.eup %1117 }
 0x302   :  { %746 = vadd.xlane.f32.xlu1 %v1118_v9 }
 0x313   :  { %760 = vperm.xlu1 %1058, %v732_v10  }
 0x316   :  { %757 = vperm.xlu0 %1057, %v731_v11  }
 0x38d   :  { %v745_v12 = vpop.xlane.xlu0 %744 }
 0x38e   :  { %1119 = vlog2.f32 %v745_v12 }
 0x38f   :  { %v747_v13 = vpop.xlane.xlu1 %746 }
 0x390   :  { %1121 = vlog2.f32 %v747_v13 }
 0x393   :  { %v761_v16 = vpop.permute.xlu1 %760 }
 0x394   :  { %vm763_vm5 = vcmp.eq.s32.totalorder %v1332_v14, %v761_v16 }
 0x395   :  { %v758_v15 = vpop.permute.xlu0 %757  ;;  %v936_v25 = vsel %vm763_vm5, 1.0, %v1201_v0 }
 0x396   :  { %vm762_vm4 = vcmp.eq.s32.totalorder %v1332_v14, %v758_v15  ;;  %v783_v30 = vmul.f32 %v937_v18, %v936_v25 }
 0x397   :  { %v935_v22 = vsel %vm762_vm4, 1.0, %v1201_v0 }
 0x398   :  { %v1120_v17 = vpop.eup %1119  ;;  %v782_v29 = vmul.f32 %v937_v18, %v935_v22 }
 0x399   :  { %v749_v19 = vmul.f32 0.6931472, %v1120_v17 }
 0x39a   :  { %v1122_v21 = vpop.eup %1121 }
 0x39b   :  { %v751_v23 = vmul.f32 0.6931472, %v1122_v21  ;;  %v752_v24 = vsub.f32 %v738_v3, %v749_v19 }
 0x39d   :  { %v768_v26 = vmul.f32 %v935_v22, %v752_v24  ;;  %v753_v27 = vsub.f32 %v739_v6, %v751_v23 }
 0x39f   :  { %770 = vadd.xlane.f32.xlu1 %v768_v26  ;;  %v769_v28 = vmul.f32 %v936_v25, %v753_v27 }
 0x3a1   :  { %772 = vadd.xlane.f32.xlu0 %v769_v28 }
 0x3a3   :  { %784 = vadd.xlane.f32.xlu1 %v782_v29 }
 0x3a7   :  { %786 = vadd.xlane.f32.xlu1 %v783_v30 }
 0x42c   :  { %v771_v31 = vpop.xlane.xlu1 %770 }
 0x42d   :  { %v774_v34 = vsub.f32 0.0, %v771_v31 }
 0x42e   :  { %v773_v32 = vpop.xlane.xlu0 %772 }
 0x42f   :  { %v775_v35 = vsub.f32 0.0, %v773_v32 }
 0x430   :  { %v785_v33 = vpop.xlane.xlu1 %784 }
 0x431   :  { %v788_v36 = vmul.f32 %v785_v33, %v774_v34  ;;  %v804_v43 = vsel %vm790_vm6, %v785_v33, 0.0 }
 0x433   :  { %v791_v39 = vsel %vm790_vm6, %v788_v36, 0.0 }
 0x434   :  { %v787_v37 = vpop.xlane.xlu1 %786 }
 0x435   :  { %v789_v38 = vmul.f32 %v787_v37, %v775_v35  ;;  %v805_v42 = vsel %vm790_vm6, %v787_v37, 0.0 }
 0x436   :  { %v806_v44 = vadd.f32 %v805_v42, %v804_v43 }
 0x437   :  { %v792_v40 = vsel %vm790_vm6, %v789_v38, 0.0 }
 0x438   :  { %v793_v41 = vadd.f32 %v792_v40, %v791_v39 }
 0x43a   :  { %794 = vadd.xlane.f32.xlu1 %v793_v41 }
 0x43e   :  { %807 = vadd.xlane.f32.xlu1 %v806_v44 }
 0x4c7   :  { %v795_v45 = vpop.xlane.xlu1 %794 }
 0x4c8   :  { %v796_v46 = vrot.slane %v795_v45, 4 }
 0x4ca   :  { %v797_v47 = vadd.f32 %v796_v46, %v795_v45 }
 0x4cb   :  { %v808_v48 = vpop.xlane.xlu1 %807 }
 0x4cc   :  { %v798_v49 = vrot.slane %v797_v47, 2  ;;  %v809_v50 = vrot.slane %v808_v48, 4 }
 0x4ce   :  { %v810_v51 = vadd.f32 %v809_v50, %v808_v48  ;;  %v799_v52 = vadd.f32 %v798_v49, %v797_v47 }
 0x4d0   :  { %v811_v53 = vrot.slane %v810_v51, 2  ;;  %v800_v54 = vrot.slane %v799_v52, 1 }
 0x4d2   :  { %v801_v55 = vadd.f32 %v800_v54, %v799_v52  ;;  %v812_v56 = vadd.f32 %v811_v53, %v810_v51 }
 0x4d4   :  { %1026 = vpush %v801_v55  ;;  %v813_v57 = vrot.slane %v812_v56, 1 }
 0x4d6   :  { %v814_v58 = vadd.f32 %v813_v57, %v812_v56 }
 0x4d8   :  { %1028 = vpush %v814_v58 }
 0x505   :  { %s1027_s3 = spop %1026 }
 0x506   :  { %v803_v60 = vstv %s1027_s3 }
 0x507   :  { %v818_v0 = vadd.f32 %v817_v59, %v803_v60 }
 0x509   :  { %820 = vst.msk [vmem:[#allocation2] sm:$0x1] %vm129_vm7, %v818_v0  ;;  %s1029_s20 = spop %1028 }
 0x50a   :  { %v816_v62 = vstv %s1029_s20 }
 0x50b   :  { %v822_v63 = vadd.f32 %v821_v61, %v816_v62 }
 0x50d   :  { %823 = vst.msk [vmem:[#allocation3] sm:$0x1] %vm129_vm7, %v822_v63 }
 0x510   :  { %v828_v1 = vld [vmem:[#allocation2] sm:$0x1] }
 0x511   :  { %843 = vperm.xlu0 %1057, %v828_v1  }
 0x514   :  { %v830_v2 = vld [vmem:[#allocation3] sm:$0x1] }
 0x515   :  { %833 = vperm.xlu1 %1058, %v830_v2  }
 0x590   :  { %v844_v3 = vpop.permute.xlu0 %843 }
 0x591   :  { %v849_v6 = vrot.slane %v844_v3, %v1316_v20 }
 0x594   :  { %v834_v4 = vpop.permute.xlu1 %833 }
 0x595   :  { %v839_v5 = vrot.slane %v834_v4, %v1316_v20 }
 0x597   :  { %v840_v7 = vsel %vm829_vm8, %v839_v5, 0.0 }
 0x598   :  { %v850_v8 = vsel %vm827_vm9, %v849_v6, %v840_v7 }
 0x599   :  { %851 = vst [vmem:[#allocation9] sm:$0x1] %v850_v8 }
 0x59a   :  { %1178 = shalt.err (!%p1175_p6)
}
 0x59b   :  { %s1179_s27 = scalar_lea.hbm %s1371_s8, 16 }
 0x59c   :  { %p1180_p7 = scmp.ne.s32.totalorder %s1371_s8, %s1179_s27  ;;  %p1183_p8 = scmp.lt.u32.totalorder %s1179_s27, %s1371_s8 }
 0x59e   :  { %p1185_p9 = pnand %p1183_p8, %p1180_p7 }
 0x5a0   :  { %1188 = shalt.err (!%p1185_p9)
}
 0x5a1   :  { %861 = dma.vmem_to_hbm [thread:$0]  %s859_s22, 16, %s1371_s8, [#allocation6]  }
 0x5a2   :  { %1193 = dma.done.wait [#allocation6], 16  }
 0x5a3   :  { %1194 = vsyncadd [#allocation6], 4294967280 }
 0x5a4   :  { %865 = vsyncpa [#allocation5], 1 }
 0x5a5   :  { %866 = vsyncpa [#allocation8], 1 }
 0x5a6   :  { %867 = vsyncpa [#allocation6], 1 }

</bundles_post_ra>
